<compile_context>
chip_gen: v7x
topology: tpu7x:2x2x1
jax: 0.10.0
libtpu: 0.0.40
codegen_flags: <defaults>
</compile_context>

<pallas_src>
import functools

import jax
import jax.numpy as jnp
from jax import lax
from jax.experimental import pallas as pl
from jax.experimental.pallas import tpu as pltpu

_LANES = 128
# Per-block HBM byte budget keyed by itemsize. Chosen so the worst case
# (2x input double-buffer + f32 upcast + square intermediates) stays well under
# a 32 MiB scoped-VMEM limit on every generation.
_TILE_BYTES = {4: 8 << 20, 2: 4 << 20, 1: 2 << 20}
_VMEM_LIMIT = 32 * 1024 * 1024


def _l2_prior_kernel(x_ref, o_ref, *, tile_rows, grid_steps, steps_per_core,
                     tail_rows, has_pad_step):
    c = pl.program_id(0)              # TensorCore split (parallel axis)
    i = pl.program_id(1)              # row-tile step within this core (arbitrary axis)
    t = c * steps_per_core + i        # global row-tile index

    @pl.when(i == 0)
    def _():
        o_ref[...] = jnp.zeros_like(o_ref)

    def _accum(v):
        sq = v * v
        # (tile_rows,128) -> (tile_rows//8, 8, 128); reducing the leading axis is
        # pure VPU vreg adds into the resident (1,8,128) output accumulator.
        o_ref[...] += jnp.sum(sq.reshape(tile_rows // 8, 8, _LANES), axis=0)[None]

    ragged = tail_rows != tile_rows   # static

    if (not ragged) and (not has_pad_step):
        # evenly tiled, even core split: no masking, no branches in the hot loop
        _accum(x_ref[...].astype(jnp.float32))
    else:
        is_tail = t == grid_steps - 1
        in_range = t < grid_steps     # False only for the one padded step of an odd split

        @pl.when(jnp.logical_and(in_range, jnp.logical_not(is_tail)))
        def _():
            _accum(x_ref[...].astype(jnp.float32))

        @pl.when(is_tail)
        def _():
            v = x_ref[...].astype(jnp.float32)
            if ragged:
                # cheap (tile_rows,1) row mask, applied BEFORE squaring so garbage
                # rows of the partial boundary block cannot propagate NaN/Inf
                row_ids = lax.broadcasted_iota(jnp.int32, (tile_rows, 1), 0)
                v = jnp.where(row_ids < tail_rows, v, 0.0)
            _accum(v)


def l2_prior(x: jax.Array, reduction: str = "mean") -> jax.Array:
    """Pallas TPU implementation of L2Prior.forward: reduction(x**2) * 0.5."""
    assert reduction in ("mean", "sum")
    n = x.size
    out_float = jnp.issubdtype(x.dtype, jnp.floating)
    if n == 0:  # torch: mean of empty -> nan, sum of empty -> 0
        res = jnp.float32(jnp.nan) if reduction == "mean" else jnp.float32(0.0)
        return res.astype(x.dtype) if out_float else res

    itemsize = jnp.dtype(x.dtype).itemsize
    sub = {4: 8, 2: 16, 1: 32}.get(itemsize, 8)   # sublane granularity by dtype width

    flat = jnp.ravel(x)                       # native dtype; kernel upcasts per tile
    n_main = (n // _LANES) * _LANES           # lane-aligned prefix handled by the kernel
    rem = n - n_main

    # <=127-element lane remainder: tiny jnp epilogue instead of a full-tensor pad copy.
    rem_sum = jnp.float32(0.0)
    if rem:
        rem_sum = jnp.sum(flat[n_main:].astype(jnp.float32) ** 2)

    if n_main == 0:
        # tensors with <128 elements: the epilogue above already covered everything
        total = rem_sum
    else:
        # TODO(synk): for non-multiple-of-128 sizes the prefix slice below may still
        # materialize one extra copy; a fully in-kernel lane-tail mask would remove it.
        main = flat if rem == 0 else flat[:n_main]
        n_rows = n_main // _LANES
        if n_rows < sub:                      # tiny tensor: pad rows up to one sublane tile
            main = jnp.pad(main, (0, sub * _LANES - n_main))
            n_rows = sub
        x2d = main.reshape(n_rows, _LANES)

        budget_rows = _TILE_BYTES.get(itemsize, 8 << 20) // (_LANES * itemsize)
        tile_rows = min((budget_rows // sub) * sub, (n_rows // sub) * sub)
        grid_steps = pl.cdiv(n_rows, tile_rows)
        tail_rows = n_rows - (grid_steps - 1) * tile_rows   # valid rows in last tile

        # Split row tiles across 2 TensorCores (v7x); sequential & ~free on 1-TC chips.
        num_cores = 2 if grid_steps >= 2 else 1
        steps_per_core = pl.cdiv(grid_steps, num_cores)
        has_pad_step = num_cores * steps_per_core > grid_steps   # odd split -> one dummy step

        if has_pad_step:
            def in_index_map(c, i):
                # clamp the single padded step onto a valid block; kernel skips its sum
                return (jnp.minimum(c * steps_per_core + i, grid_steps - 1), 0)
        else:
            def in_index_map(c, i):
                return (c * steps_per_core + i, 0)

        partials = pl.pallas_call(
            functools.partial(
                _l2_prior_kernel,
                tile_rows=tile_rows,
                grid_steps=grid_steps,
                steps_per_core=steps_per_core,
                tail_rows=tail_rows,
                has_pad_step=has_pad_step,
            ),
            out_shape=jax.ShapeDtypeStruct((num_cores, 8, _LANES), jnp.float32),
            grid_spec=pltpu.PrefetchScalarGridSpec(
                num_scalar_prefetch=0,
                grid=(num_cores, steps_per_core),
                in_specs=[pl.BlockSpec((tile_rows, _LANES), in_index_map)],
                out_specs=pl.BlockSpec((1, 8, _LANES), lambda c, i: (c, 0, 0)),
            ),
            compiler_params=pltpu.CompilerParams(
                dimension_semantics=("parallel", "arbitrary"),
                vmem_limit_bytes=_VMEM_LIMIT,
            ),
        )(x2d)
        total = jnp.sum(partials, dtype=jnp.float32) + rem_sum

    scale = (0.5 / n) if reduction == "mean" else 0.5
    res = total * jnp.float32(scale)
    if out_float:
        res = res.astype(x.dtype)     # torch semantics: result dtype == input dtype
    return res


if __name__ == "__main__":
    key = jax.random.PRNGKey(0)
    x = jax.random.normal(key, (2, 4, 16, 16), dtype=jnp.float32)  # NCHW

    # mean reduction (default)
    result = jax.block_until_ready(l2_prior(x, reduction="mean"))
    ref = 0.5 * jnp.mean(x ** 2)
    assert jnp.allclose(result, ref, rtol=1e-6, atol=1e-6), (result, ref)

    # sum reduction
    result_s = jax.block_until_ready(l2_prior(x, reduction="sum"))
    ref_s = 0.5 * jnp.sum(x ** 2)
    assert jnp.allclose(result_s, ref_s, rtol=1e-5, atol=1e-5), (result_s, ref_s)

    # ragged shape: exercises the 2-way core split, in-kernel row mask and the
    # <128-element lane-remainder epilogue (no full host-side pad copy)
    y = jax.random.normal(jax.random.PRNGKey(1), (3, 5, 7, 11), dtype=jnp.float32)
    result_r = jax.block_until_ready(l2_prior(y, reduction="mean"))
    ref_r = 0.5 * jnp.mean(y ** 2)
    assert jnp.allclose(result_r, ref_r, rtol=1e-6, atol=1e-6), (result_r, ref_r)

    print("KERNEL_OK")
</pallas_src>

<mosaic_0001>
module attributes {stable_mosaic.version = 11 : i64} {
  func.func @_l2_prior_kernel(%arg0: i32, %arg1: i32, %arg2: memref<16x128xf32, #tpu.memory_space<vmem>>, %arg3: memref<1x8x128xf32, #tpu.memory_space<vmem>>) attributes {dimension_semantics = [#tpu.dimension_semantics<parallel>, #tpu.dimension_semantics<arbitrary>], iteration_bounds = array<i64: 1, 1>, scalar_prefetch = 0 : i64, scratch_operands = 0 : i64, tpu.core_type = #tpu.core_type<tc>, window_params = [{transform_indices = @transform_0, window_bounds = array<i64: 16, 128>}, {transform_indices = @transform_1, window_bounds = array<i64: 1, 8, 128>}]} {
    %c0_i32 = arith.constant 0 : i32
    %0 = arith.cmpi eq, %arg1, %c0_i32 : i32
    %1 = arith.extui %0 : i1 to i32
    %c0_i32_0 = arith.constant 0 : i32
    %2 = arith.cmpi ne, %1, %c0_i32_0 : i32
    scf.if %2 {
      %cst_8 = arith.constant 0.000000e+00 : f32
      %11 = vector.broadcast %cst_8 : f32 to vector<1x8x128xf32>
      %c0_9 = arith.constant 0 : index
      %c0_10 = arith.constant 0 : index
      %c0_11 = arith.constant 0 : index
      %12 = vector.load %arg3[%c0_9, %c0_10, %c0_11] : memref<1x8x128xf32, #tpu.memory_space<vmem>>, vector<1x8x128xf32>
      tpu.vector_store %arg3[%c0_9, %c0_10, %c0_11], %11 {strides = array<i32>} : memref<1x8x128xf32, #tpu.memory_space<vmem>>, vector<1x8x128xf32>,
    } else {
    }
    %c0 = arith.constant 0 : index
    %c0_1 = arith.constant 0 : index
    %3 = vector.load %arg2[%c0, %c0_1] : memref<16x128xf32, #tpu.memory_space<vmem>>, vector<16x128xf32>
    %4 = arith.mulf %3, %3 : vector<16x128xf32>
    %c0_2 = arith.constant 0 : index
    %c0_3 = arith.constant 0 : index
    %c0_4 = arith.constant 0 : index
    %5 = vector.load %arg3[%c0_2, %c0_3, %c0_4] : memref<1x8x128xf32, #tpu.memory_space<vmem>>, vector<1x8x128xf32>
    %6 = vector.shape_cast %4 : vector<16x128xf32> to vector<2x8x128xf32>
    %cst = arith.constant dense<0.000000e+00> : vector<8x128xf32>
    %7 = vector.multi_reduction <add>, %6, %cst [0] : vector<2x8x128xf32> to vector<8x128xf32>
    %8 = vector.shape_cast %7 : vector<8x128xf32> to vector<1x8x128xf32>
    %9 = arith.addf %5, %8 : vector<1x8x128xf32>
    %c0_5 = arith.constant 0 : index
    %c0_6 = arith.constant 0 : index
    %c0_7 = arith.constant 0 : index
    %10 = vector.load %arg3[%c0_5, %c0_6, %c0_7] : memref<1x8x128xf32, #tpu.memory_space<vmem>>, vector<1x8x128xf32>
    tpu.vector_store %arg3[%c0_5, %c0_6, %c0_7], %9 {strides = array<i32>} : memref<1x8x128xf32, #tpu.memory_space<vmem>>, vector<1x8x128xf32>,
    return
  }
  func.func @transform_0(%arg0: i32, %arg1: i32) -> (i32, i32) {
    %c1_i32 = arith.constant 1 : i32
    %0 = arith.muli %arg0, %c1_i32 : i32
    %1 = arith.addi %0, %arg1 : i32
    %c0_i32 = arith.constant 0 : i32
    %c0_i32_0 = arith.constant 0 : i32
    return %1, %c0_i32 : i32, i32
  }
  func.func @transform_1(%arg0: i32, %arg1: i32) -> (i32, i32, i32) {
    %c0_i32 = arith.constant 0 : i32
    %c0_i32_0 = arith.constant 0 : i32
    %c0_i32_1 = arith.constant 0 : i32
    return %arg0, %c0_i32, %c0_i32_0 : i32, i32, i32
  }
}

</mosaic_0001>

<bundles_post_ra>
// kernel: tpu_custom_call.1
= control target key start
LH: loop header
LB: loop body
LE: loop exit
PB: predicated region body
PF: predicated region fallthrough
CT: control target
= control target key end

     0   :  { %6 = vsyncpa [#allocation3], 0  ;;  %s148_s0 = inlined_call_operand.hbm [shape: f32[16,128], index: 0, kind: input, shape index: {}]   ;;  %s149_s1 = inlined_call_operand.hbm [shape: f32[1,8,128], index: 1, kind: output, shape index: {}]  }
   0x1   :  { %7 = vsyncpa [#allocation4], 0  ;;  %s110_s6 = smov [#allocation2]   ;;  %s62_s10 = scalar_lea.hbm %s148_s0, 256 }
   0x2   :  { %s17_s7 = sshll.u32 %s110_s6, 4  ;;  %p63_p0 = scmp.ne.s32.totalorder %s148_s0, %s62_s10  ;;  %s18_s7 = int_to_ptr.vmem [resolvable:$true] %s17_s7 }
   0x3   :  { %p66_p1 = scmp.lt.u32.totalorder %s62_s10, %s148_s0 }
   0x5   :  { %p68_p2 = pnand %p66_p1, %p63_p0 }
   0x7   :  { %71 = shalt.err (!%p68_p2)
}
   0x8   :  { %s72_s15 = scalar_lea.vmem %s18_s7, 256  ;;  %p77_p4 = scmp.lt.s32.totalorder %s18_s7, %s18_s7 }
   0x9   :  { %p73_p3 = scmp.ne.s32.totalorder %s18_s7, %s72_s15  ;;  %p78_p5 = scmp.lt.s32.totalorder %s72_s15, %s72_s15 }
   0xb   :  { %p79_p6 = por %p78_p5, %p77_p4 }
   0xd   :  { %p80_p7 = pnand %p79_p6, %p73_p3 }
   0xf   :  { %83 = shalt.err (!%p80_p7)
}
  0x10   :  { %s111_s16 = smov 128   ;;  %s112_s17 = smov 8  }
  0x11   :  { %23 = dma.hbm_to_vmem [thread:$0]  %s148_s0, 256, %s18_s7, [#allocation3], %s111_s16, %s111_s16, %s112_s17  }
  0x12   :  { %106 = dma.done.wait [#allocation3], 256  }
  0x13   :  { %107 = vsyncadd [#allocation3], 4294967040  ;;  %v34_v0 = vld [vmem:[#allocation2] sm:$0xff]  ;;  %v35_v1 = vld [vmem:[#allocation2 + $0x8] sm:$0xff]  ;;  %s113_s20 = smov [#allocation5]  }
  0x14   :  { %v36_v2 = vmul.f32 %v34_v0, %v34_v0  ;;  %v37_v3 = vmul.f32 %v35_v1, %v35_v1  ;;  %s48_s21 = sshll.u32 %s113_s20, 4  ;;  %s49_s21 = int_to_ptr.vmem [resolvable:$true] %s48_s21 }
  0x15   :  { %s84_s22 = scalar_lea.vmem %s49_s21, 128  ;;  %p89_p9 = scmp.lt.s32.totalorder %s49_s21, %s49_s21 }
  0x16   :  { %v39_v4 = vadd.f32 %v37_v3, %v36_v2  ;;  %p85_p8 = scmp.ne.s32.totalorder %s49_s21, %s84_s22  ;;  %p90_p10 = scmp.lt.s32.totalorder %s84_s22, %s84_s22 }
  0x18   :  { %41 = vst [vmem:[#allocation5] sm:$0xff] %v39_v4  ;;  %p91_p11 = por %p90_p10, %p89_p9 }
  0x1a   :  { %p92_p12 = pnand %p91_p11, %p85_p8 }
  0x1c   :  { %95 = shalt.err (!%p92_p12)
}
  0x1d   :  { %s96_s24 = scalar_lea.hbm %s149_s1, 128 }
  0x1e   :  { %p97_p13 = scmp.ne.s32.totalorder %s149_s1, %s96_s24  ;;  %p100_p0 = scmp.lt.u32.totalorder %s96_s24, %s149_s1 }
  0x20   :  { %p102_p1 = pnand %p100_p0, %p97_p13 }
  0x22   :  { %105 = shalt.err (!%p102_p1)
}
  0x23   :  { %51 = dma.vmem_to_hbm [thread:$0]  %s49_s21, 128, %s149_s1, [#allocation4]  }
  0x24   :  { %108 = dma.done.wait [#allocation4], 128  }
  0x25   :  { %109 = vsyncadd [#allocation4], 4294967168 }
  0x26   :  { %55 = vsyncpa [#allocation3], 1 }
  0x27   :  { %56 = vsyncpa [#allocation4], 1 }

</bundles_post_ra>
